<compile_context>
chip_gen: v7x
topology: tpu7x:2x2x1
jax: 0.10.0
libtpu: 0.0.40
codegen_flags: <defaults>
</compile_context>

<pallas_src>
import functools

import jax
import jax.numpy as jnp
from jax import lax
from jax.experimental import pallas as pl
from jax.experimental.pallas import tpu as pltpu

_LANES = 128
_VMEM_BUDGET_BYTES = 24 * 1024 * 1024   # target per-step working set
_VMEM_LIMIT_BYTES = 32 * 1024 * 1024    # explicit scoped-VMEM limit (safe v5e/v6e/v7x)
_MAX_BLOCK_B = 8192
_MIN_BLOCK_B = 128


def _round_up(a: int, b: int) -> int:
    return (a + b - 1) // b * b


def _pick_block_b(batch: int, d_in: int, x_itemsize: int) -> int:
    """Largest batch tile (multiple of 128, <= 8192) fitting the VMEM budget."""
    # Per-row VMEM: x double-buffer + out double-buffer + f32 hidden temporaries.
    per_row = 2 * d_in * x_itemsize + 2 * 4 + 2 * _LANES * 4
    # Resident weights (w1p, b1p, w2p), generously doubled.
    fixed = 2 * (d_in * _LANES * 4 + 2 * _LANES * 4)
    tb = max(_VMEM_BUDGET_BYTES - fixed, 0) // per_row
    tb = (tb // _LANES) * _LANES
    tb = max(_MIN_BLOCK_B, min(_MAX_BLOCK_B, tb))
    # Don't exceed the (lane-rounded) batch itself ...
    tb = min(tb, max(_MIN_BLOCK_B, _round_up(batch, _LANES)))
    # ... and once B is large, keep >= 2 grid blocks so both v7x TCs get work.
    if batch > _MIN_BLOCK_B:
        tb = min(tb, max(_MIN_BLOCK_B, _round_up(-(-batch // 2), _LANES)))
    return tb


def _mlp_kernel(x_ref, w1_ref, b1_ref, w2_ref, o_ref, *, valid_rows, block_b):
    # fc1 on the MXU: (TB, D_in) @ (D_in, Hp) -> (TB, Hp), f32 accumulate.
    h = jnp.dot(x_ref[...], w1_ref[...], preferred_element_type=jnp.float32)
    # Bias + ReLU on the VPU (Hp = 128 padding -> full-lane vregs).
    h = jnp.maximum(h + b1_ref[...], 0.0)
    # fc2 (D_out == 1, bias folded into the padded hidden column): VPU multiply
    # against the w2 row + lane reduction -> (TB, 1) column.  Avoids an XLU
    # transpose of h and a degenerate N=1 MXU matmul.
    y = jnp.sum(h * w2_ref[...], axis=1, keepdims=True)
    # Mask tail rows of the last (partial) block: those x rows were read OOB
    # (undefined data); keep the discarded output rows deterministic zeros.
    row = (pl.program_id(0) * block_b
           + lax.broadcasted_iota(jnp.int32, (block_b, 1), 0))
    o_ref[...] = jnp.where(row < valid_rows, y, 0.0).astype(o_ref.dtype)


def prepare_params(w1, b1, w2, b2, *, compute_dtype=jnp.float32):
    """Pad parameters once (hoisted out of the per-call path).

    w1: (D_in, H)  (transposed PyTorch fc1.weight)
    b1: (1, H) or (H,)
    w2: (H, 1)     (transposed PyTorch fc2.weight), D_out must be 1
    b2: (1, 1) or scalar

    Pads the hidden dim to a multiple of 128 lanes and folds b2 into one extra
    hidden column (w1 col = 0, b1 = 1 -> relu = 1, w2 entry = b2).
    """
    d_in, h = w1.shape
    assert w2.shape == (h, 1), "kernel specialised for the module default D_out=1"
    hp = _round_up(h + 1, _LANES)

    w1p = jnp.zeros((d_in, hp), compute_dtype).at[:, :h].set(
        jnp.asarray(w1, compute_dtype))
    b1p = jnp.zeros((1, hp), jnp.float32).at[0, :h].set(
        jnp.asarray(b1, jnp.float32).reshape(h))
    b1p = b1p.at[0, h].set(1.0)                                   # relu(1) = 1
    w2p = jnp.zeros((1, hp), jnp.float32).at[0, :h].set(
        jnp.asarray(w2, jnp.float32).reshape(h))
    w2p = w2p.at[0, h].set(jnp.asarray(b2, jnp.float32).reshape(()))  # b2 fold
    return w1p, b1p, w2p


def net_forward(x, prepared_params, *, block_b=None):
    """Forward pass of `Net` as a batch-tiled Pallas TPU kernel.

    Args:
      x: (B, D_in) float32 (or bfloat16 if prepare_params used bf16).
      prepared_params: output of prepare_params().
    Returns:
      (B,) float32 for B > 1, scalar for B == 1 (PyTorch .squeeze()).
    """
    w1p, b1p, w2p = prepared_params
    batch, d_in = x.shape
    assert w1p.shape[0] == d_in
    hp = w1p.shape[1]

    x = x.astype(w1p.dtype)   # no-op when dtypes already match (bf16 stays bf16)

    tb = block_b if block_b is not None else _pick_block_b(
        batch, d_in, jnp.dtype(x.dtype).itemsize)
    num_blocks = -(-batch // tb)            # cdiv; tail block reads OOB rows
    padded_batch = num_blocks * tb

    kernel = functools.partial(_mlp_kernel, valid_rows=batch, block_b=tb)

    out = pl.pallas_call(
        kernel,
        out_shape=jax.ShapeDtypeStruct((padded_batch, 1), jnp.float32),
        grid_spec=pltpu.PrefetchScalarGridSpec(
            num_scalar_prefetch=0,
            grid=(num_blocks,),
            in_specs=[
                # x: streamed per batch tile (no padded copy of x is made).
                pl.BlockSpec((tb, d_in), lambda i: (i, 0)),
                # Weights / biases: full arrays, constant index maps -> stay
                # VMEM-resident across the whole grid.
                pl.BlockSpec((d_in, hp), lambda i: (0, 0)),
                pl.BlockSpec((1, hp), lambda i: (0, 0)),
                pl.BlockSpec((1, hp), lambda i: (0, 0)),
            ],
            out_specs=pl.BlockSpec((tb, 1), lambda i: (i, 0)),
        ),
        compiler_params=pltpu.CompilerParams(
            dimension_semantics=("parallel",),
            vmem_limit_bytes=_VMEM_LIMIT_BYTES,
        ),
    )(x, w1p, b1p, w2p)

    # Drop padded tail rows; back to (B,), PyTorch .squeeze() semantics.
    return jnp.squeeze(out[:batch, 0])


if __name__ == "__main__":
    key = jax.random.PRNGKey(0)
    kx, k1, k2, k3, k4 = jax.random.split(key, 5)

    B, D_IN, H, D_OUT = 8, 32, 15, 1
    x = jax.random.normal(kx, (B, D_IN), dtype=jnp.float32)
    w1 = jax.random.normal(k1, (D_IN, H), dtype=jnp.float32) * 0.1
    b1 = jax.random.normal(k2, (1, H), dtype=jnp.float32) * 0.1
    w2 = jax.random.normal(k3, (H, D_OUT), dtype=jnp.float32) * 0.1
    b2 = jax.random.normal(k4, (1, D_OUT), dtype=jnp.float32) * 0.1

    params = prepare_params(w1, b1, w2, b2)       # hoisted: pad / fold b2 once
    y = net_forward(x, params)
    y = jax.block_until_ready(y)

    # Reference: plain JAX, same math as the PyTorch module.
    ref = jnp.squeeze(jnp.maximum(x @ w1 + b1, 0.0) @ w2 + b2)
    assert y.shape == (B,), y.shape
    assert jnp.allclose(y, ref, atol=1e-5, rtol=1e-5), "mismatch vs reference"

    print("KERNEL_OK")
</pallas_src>

<mosaic_0001>
module attributes {stable_mosaic.version = 11 : i64} {
  func.func @_mlp_kernel(%arg0: i32, %arg1: memref<128x32xf32, #tpu.memory_space<vmem>>, %arg2: memref<32x128xf32, #tpu.memory_space<vmem>>, %arg3: memref<1x128xf32, #tpu.memory_space<vmem>>, %arg4: memref<1x128xf32, #tpu.memory_space<vmem>>, %arg5: memref<128x1xf32, #tpu.memory_space<vmem>>) attributes {dimension_semantics = [#tpu.dimension_semantics<parallel>], iteration_bounds = array<i64: 1>, scalar_prefetch = 0 : i64, scratch_operands = 0 : i64, tpu.core_type = #tpu.core_type<tc>, window_params = [{transform_indices = @transform_0, window_bounds = array<i64: 128, 32>}, {pipeline_mode = #tpu.pipeline_mode<synchronous>, transform_indices = @transform_1, window_bounds = array<i64: 32, 128>}, {pipeline_mode = #tpu.pipeline_mode<synchronous>, transform_indices = @transform_2, window_bounds = array<i64: 1, 128>}, {pipeline_mode = #tpu.pipeline_mode<synchronous>, transform_indices = @transform_3, window_bounds = array<i64: 1, 128>}, {transform_indices = @transform_4, window_bounds = array<i64: 128, 1>}]} {
    %c0 = arith.constant 0 : index
    %c0_0 = arith.constant 0 : index
    %0 = vector.load %arg1[%c0, %c0_0] : memref<128x32xf32, #tpu.memory_space<vmem>>, vector<128x32xf32>
    %c0_1 = arith.constant 0 : index
    %c0_2 = arith.constant 0 : index
    %1 = vector.load %arg2[%c0_1, %c0_2] : memref<32x128xf32, #tpu.memory_space<vmem>>, vector<32x128xf32>
    %cst = arith.constant dense<0.000000e+00> : vector<128x128xf32>
    %2 = tpu.matmul %0, %1, %cst {dimension_numbers = #tpu.dot_dimension_numbers<[1], [0], [0], [1], [0, 0, 1, 1], [], []>} : vector<128x32xf32>, vector<32x128xf32>, vector<128x128xf32> -> vector<128x128xf32>
    %c0_3 = arith.constant 0 : index
    %c0_4 = arith.constant 0 : index
    %3 = vector.load %arg3[%c0_3, %c0_4] : memref<1x128xf32, #tpu.memory_space<vmem>>, vector<1x128xf32>
    %4 = vector.broadcast %3 : vector<1x128xf32> to vector<128x128xf32>
    %5 = arith.addf %2, %4 : vector<128x128xf32>
    %cst_5 = arith.constant 0.000000e+00 : f32
    %6 = vector.broadcast %cst_5 : f32 to vector<128x128xf32>
    %7 = arith.maximumf %5, %6 : vector<128x128xf32>
    %c0_6 = arith.constant 0 : index
    %c0_7 = arith.constant 0 : index
    %8 = vector.load %arg4[%c0_6, %c0_7] : memref<1x128xf32, #tpu.memory_space<vmem>>, vector<1x128xf32>
    %9 = vector.broadcast %8 : vector<1x128xf32> to vector<128x128xf32>
    %10 = arith.mulf %7, %9 : vector<128x128xf32>
    %cst_8 = arith.constant dense<0.000000e+00> : vector<128xf32>
    %11 = vector.multi_reduction <add>, %10, %cst_8 [1] : vector<128x128xf32> to vector<128xf32>
    %12 = vector.shape_cast %11 : vector<128xf32> to vector<128x1xf32>
    %c128_i32 = arith.constant 128 : i32
    %13 = arith.muli %arg0, %c128_i32 : i32
    %14 = tpu.iota {dimensions = array<i32: 0>} : vector<128x1xi32>
    %15 = vector.broadcast %13 : i32 to vector<128x1xi32>
    %16 = arith.addi %15, %14 : vector<128x1xi32>
    %c8_i32 = arith.constant 8 : i32
    %17 = vector.broadcast %c8_i32 : i32 to vector<128x1xi32>
    %18 = arith.cmpi slt, %16, %17 : vector<128x1xi32>
    %cst_9 = arith.constant 0.000000e+00 : f32
    %19 = vector.broadcast %cst_9 : f32 to vector<128x1xf32>
    %20 = arith.select %18, %12, %19 : vector<128x1xi1>, vector<128x1xf32>
    %c0_10 = arith.constant 0 : index
    %c0_11 = arith.constant 0 : index
    %21 = vector.load %arg5[%c0_10, %c0_11] : memref<128x1xf32, #tpu.memory_space<vmem>>, vector<128x1xf32>
    tpu.vector_store %arg5[%c0_10, %c0_11], %20 {strides = array<i32>} : memref<128x1xf32, #tpu.memory_space<vmem>>, vector<128x1xf32>,
    return
  }
  func.func @transform_0(%arg0: i32) -> (i32, i32) {
    %c0_i32 = arith.constant 0 : i32
    %c0_i32_0 = arith.constant 0 : i32
    return %arg0, %c0_i32 : i32, i32
  }
  func.func @transform_1(%arg0: i32) -> (i32, i32) {
    %c0_i32 = arith.constant 0 : i32
    %c0_i32_0 = arith.constant 0 : i32
    %c0_i32_1 = arith.constant 0 : i32
    return %c0_i32, %c0_i32_0 : i32, i32
  }
  func.func @transform_2(%arg0: i32) -> (i32, i32) {
    %c0_i32 = arith.constant 0 : i32
    %c0_i32_0 = arith.constant 0 : i32
    %c0_i32_1 = arith.constant 0 : i32
    return %c0_i32, %c0_i32_0 : i32, i32
  }
  func.func @transform_3(%arg0: i32) -> (i32, i32) {
    %c0_i32 = arith.constant 0 : i32
    %c0_i32_0 = arith.constant 0 : i32
    %c0_i32_1 = arith.constant 0 : i32
    return %c0_i32, %c0_i32_0 : i32, i32
  }
  func.func @transform_4(%arg0: i32) -> (i32, i32) {
    %c0_i32 = arith.constant 0 : i32
    %c0_i32_0 = arith.constant 0 : i32
    return %arg0, %c0_i32 : i32, i32
  }
}

</mosaic_0001>

<bundles_post_ra>
// kernel: tpu_custom_call.1
= control target key start
LH: loop header
LB: loop body
LE: loop exit
PB: predicated region body
PF: predicated region fallthrough
CT: control target
= control target key end

     0   :  { %9 = vsyncpa [#allocation3], 0  ;;  %s702_s0 = inlined_call_operand.hbm [shape: f32[8,32], index: 0, kind: input, shape index: {}]   ;;  %s703_s1 = inlined_call_operand.hbm [shape: f32[32,128], index: 1, kind: input, shape index: {}]   ;;  %s704_s2 = inlined_call_operand.vmem [shape: f32[1,128], index: 2, kind: input, shape index: {}]   ;;  %s705_s3 = inlined_call_operand.vmem [shape: f32[1,128], index: 3, kind: input, shape index: {}]   ;;  %s706_s4 = inlined_call_operand.vmem [shape: f32[128,1], index: 4, kind: output, shape index: {}]  }
   0x1   :  { %10 = vsyncpa [#allocation5], 0 }
   0x2   :  { %15 = vsyncadd [#allocation3], 1920  ;;  %s562_s15 = smov [#allocation2]   ;;  %s514_s19 = scalar_lea.hbm %s702_s0, 128 }
   0x3   :  { %s16_s16 = sshll.u32 %s562_s15, 4  ;;  %p515_p0 = scmp.ne.s32.totalorder %s702_s0, %s514_s19  ;;  %s17_s16 = int_to_ptr.vmem [resolvable:$true] %s16_s16 }
   0x4   :  { %p518_p1 = scmp.lt.u32.totalorder %s514_s19, %s702_s0 }
   0x6   :  { %p520_p2 = pnand %p518_p1, %p515_p0 }
   0x8   :  { %523 = shalt.err (!%p520_p2)
}
   0x9   :  { %s524_s24 = scalar_lea.vmem %s17_s16, 128  ;;  %s528_s25 = scalar_lea.vmem %s17_s16, 2048 }
   0xa   :  { %p525_p3 = scmp.ne.s32.totalorder %s17_s16, %s524_s24  ;;  %p529_p4 = scmp.lt.s32.totalorder %s17_s16, %s17_s16 }
   0xb   :  { %p530_p5 = scmp.lt.s32.totalorder %s528_s25, %s524_s24 }
   0xd   :  { %p531_p6 = por %p530_p5, %p529_p4 }
   0xf   :  { %p532_p7 = pnand %p531_p6, %p525_p3 }
  0x11   :  { %535 = shalt.err (!%p532_p7)
}
  0x12   :  { %s563_s26 = smov 128   ;;  %s564_s27 = smov 8  }
  0x13   :  { %22 = dma.hbm_to_vmem [thread:$0]  %s702_s0, 128, %s17_s16, [#allocation3], %s563_s26, %s563_s26, %s564_s27  }
  0x14   :  { %s565_s30 = smov [#allocation4]   ;;  %s536_s8 = scalar_lea.hbm %s703_s1, 512 }
  0x15   :  { %s28_s5 = sshll.u32 %s565_s30, 4  ;;  %p537_p8 = scmp.ne.s32.totalorder %s703_s1, %s536_s8  ;;  %s29_s5 = int_to_ptr.vmem [resolvable:$true] %s28_s5 }
  0x16   :  { %p540_p9 = scmp.lt.u32.totalorder %s536_s8, %s703_s1 }
  0x18   :  { %p542_p10 = pnand %p540_p9, %p537_p8 }
  0x1a   :  { %545 = shalt.err (!%p542_p10)
}
  0x1b   :  { %s546_s13 = scalar_lea.vmem %s29_s5, 512  ;;  %p551_p12 = scmp.lt.s32.totalorder %s29_s5, %s29_s5 }
  0x1c   :  { %p547_p11 = scmp.ne.s32.totalorder %s29_s5, %s546_s13  ;;  %p552_p13 = scmp.lt.s32.totalorder %s546_s13, %s546_s13 }
  0x1e   :  { %p553_p0 = por %p552_p13, %p551_p12 }
  0x20   :  { %p554_p1 = pnand %p553_p0, %p547_p11 }
  0x22   :  { %557 = shalt.err (!%p554_p1)
}
  0x23   :  { %34 = dma.hbm_to_vmem [thread:$0]  %s703_s1, 512, %s29_s5, [#allocation5], %s563_s26, %s563_s26, %s564_s27  }
  0x24   :  { %558 = dma.done.wait [#allocation3], 2048  }
  0x25   :  { %559 = vsyncadd [#allocation3], 4294965248 }
  0x26   :  { %560 = dma.done.wait [#allocation5], 512  }
  0x27   :  { %561 = vsyncadd [#allocation5], 4294966784  ;;  %vm72_vm0 = vcmask 261120   ;;  %v61_v0 = vld [vmem:[#allocation4] sm:$0xff]  ;;  %v62_v1 = vld [vmem:[#allocation4 + $0x8] sm:$0xff]  ;;  %vm404_vm1 = vcmask 7168  }
  0x28   :  { %v63_v2 = vld [vmem:[#allocation4 + $0x10] sm:$0xff]  ;;  %v497_v3 = vpack.c.bf16 %v62_v1, %v61_v0  ;;  %v64_v4 = vld [vmem:[#allocation4 + $0x18] sm:$0xff]  ;;  %v45_v5 = vld [vmem:[#allocation2] sm:$0xff]  ;;  %v566_v43 = vmov 0.0  }
  0x29   :  { %v501_v6 = vpack.c.bf16 %v64_v4, %v63_v2  ;;  %473 = vmatprep.mubr.msk.f32.mxu0 %vm72_vm0, %v45_v5  ;;  %v53_v7 = vld [vmem:[#allocation2 + $0x40] sm:$0xff]  ;;  %v46_v8 = vld [vmem:[#allocation2 + $0x8] sm:$0xff]  ;;  %v47_v10 = vld [vmem:[#allocation2 + $0x10] sm:$0xff]  ;;  %406 = vst.msk [vmem:[%s706_s4 + $0x8] sm:$0xff] %vm404_vm1, %v566_v43 }
  0x2a   :  { %498 = vmatprep.subr.bf16.mxu0 %v497_v3  ;;  %505 = vmatprep.subr.bf16.mxu1 %v497_v3  ;;  %v54_v9 = vld [vmem:[#allocation2 + $0x48] sm:$0xff]  ;;  %v55_v11 = vld [vmem:[#allocation2 + $0x50] sm:$0xff]  ;;  %v48_v12 = vld [vmem:[#allocation2 + $0x18] sm:$0xff]  ;;  %407 = vst.msk [vmem:[%s706_s4 + $0x10] sm:$0xff] %vm404_vm1, %v566_v43 }
  0x2b   :  { %500 = vmatpush3.bf16.msra.mxu0 %v497_v3  ;;  %507 = vmatpush3.bf16.msra.mxu1 %v497_v3  ;;  %v56_v13 = vld [vmem:[#allocation2 + $0x58] sm:$0xff]  ;;  %v49_v14 = vld [vmem:[#allocation2 + $0x20] sm:$0xff]  ;;  %v50_v16 = vld [vmem:[#allocation2 + $0x28] sm:$0xff]  ;;  %408 = vst.msk [vmem:[%s706_s4 + $0x18] sm:$0xff] %vm404_vm1, %v566_v43 }
  0x2c   :  { %502 = vmatprep.subr.bf16.mxu0 %v501_v6  ;;  %506 = vmatprep.subr.bf16.mxu1 %v501_v6  ;;  %v57_v15 = vld [vmem:[#allocation2 + $0x60] sm:$0xff]  ;;  %v58_v17 = vld [vmem:[#allocation2 + $0x68] sm:$0xff]  ;;  %v51_v18 = vld [vmem:[#allocation2 + $0x30] sm:$0xff]  ;;  %409 = vst.msk [vmem:[%s706_s4 + $0x20] sm:$0xff] %vm404_vm1, %v566_v43 }
  0x2d   :  { %485 = vmatprep.mubr.msk.f32.mxu1 %vm72_vm0, %v53_v7  ;;  %v59_v19 = vld [vmem:[#allocation2 + $0x70] sm:$0xff]  ;;  %v52_v20 = vld [vmem:[#allocation2 + $0x38] sm:$0xff]  ;;  %v427_v22 = vld [vmem:[%s704_s2] ss:$0 sm:$0xff]  ;;  %410 = vst.msk [vmem:[%s706_s4 + $0x28] sm:$0xff] %vm404_vm1, %v566_v43 }
  0x2e   :  { %v60_v21 = vld [vmem:[#allocation2 + $0x78] sm:$0xff]  ;;  %v444_v28 = vld [vmem:[%s705_s3] ss:$0 sm:$0xff]  ;;  %411 = vst.msk [vmem:[%s706_s4 + $0x30] sm:$0xff] %vm404_vm1, %v566_v43  ;;  %412 = vst.msk [vmem:[%s706_s4 + $0x38] sm:$0xff] %vm404_vm1, %v566_v43 }
  0x2f   :  { %504 = vmatpush3.bf16.msra.mxu0 %v501_v6  ;;  %508 = vmatpush3.bf16.msra.mxu1 %v501_v6  ;;  %413 = vst.msk [vmem:[%s706_s4 + $0x40] sm:$0xff] %vm404_vm1, %v566_v43  ;;  %414 = vst.msk [vmem:[%s706_s4 + $0x48] sm:$0xff] %vm404_vm1, %v566_v43 }
  0x30   :  { %415 = vst.msk [vmem:[%s706_s4 + $0x50] sm:$0xff] %vm404_vm1, %v566_v43  ;;  %416 = vst.msk [vmem:[%s706_s4 + $0x58] sm:$0xff] %vm404_vm1, %v566_v43 }
  0x31   :  { %417 = vst.msk [vmem:[%s706_s4 + $0x60] sm:$0xff] %vm404_vm1, %v566_v43  ;;  %418 = vst.msk [vmem:[%s706_s4 + $0x68] sm:$0xff] %vm404_vm1, %v566_v43 }
  0x32   :  { %474 = vmatmul.mubr.msk.f32.vlgmr.msra.gmra.mrb[0].mxu0 %vm72_vm0, %v46_v8  ;;  %486 = vmatmul.mubr.msk.f32.vlgmr.msra.gmra.mrb[0].mxu1 %vm72_vm0, %v54_v9  ;;  %419 = vst.msk [vmem:[%s706_s4 + $0x70] sm:$0xff] %vm404_vm1, %v566_v43  ;;  %420 = vst.msk [vmem:[%s706_s4 + $0x78] sm:$0xff] %vm404_vm1, %v566_v43 }
  0x33   :  { %476 = vmatprep.mubr.msk.f32.mxu0 %vm72_vm0, %v47_v10  ;;  %488 = vmatprep.mubr.msk.f32.mxu1 %vm72_vm0, %v55_v11 }
  0x36   :  { %477 = vmatmul.mubr.msk.f32.gmra.mrb[2].mxu0 %vm72_vm0, %v48_v12  ;;  %489 = vmatmul.mubr.msk.f32.gmra.mrb[2].mxu1 %vm72_vm0, %v56_v13 }
  0x37   :  { %479 = vmatprep.mubr.msk.f32.mxu0 %vm72_vm0, %v49_v14  ;;  %491 = vmatprep.mubr.msk.f32.mxu1 %vm72_vm0, %v57_v15 }
  0x3a   :  { %480 = vmatmul.mubr.msk.f32.gmra.mrb[4].mxu0 %vm72_vm0, %v50_v16  ;;  %492 = vmatmul.mubr.msk.f32.gmra.mrb[4].mxu1 %vm72_vm0, %v58_v17 }
  0x3b   :  { %482 = vmatprep.mubr.msk.f32.mxu0 %vm72_vm0, %v51_v18  ;;  %494 = vmatprep.mubr.msk.f32.mxu1 %vm72_vm0, %v59_v19 }
  0x3e   :  { %483 = vmatmul.mubr.msk.f32.gmra.mrb[6].mxu0 %vm72_vm0, %v52_v20  ;;  %495 = vmatmul.mubr.msk.f32.gmra.mrb[6].mxu1 %vm72_vm0, %v60_v21 }
 0x105   :  { %v475_v23 = vpop.f32.mrb[0].mxu0  ;;  %v487_v24 = vpop.f32.mrb[0].mxu1 }
 0x106   :  { %v187_v25 = vpop.f32.mrb[1].mxu0  ;;  %v227_v26 = vpop.f32.mrb[1].mxu1 }
 0x107   :  { %v188_v27 = vadd.f32 %v427_v22, %v187_v25 }
 0x109   :  { %v266_v29 = vmax.f32 %v188_v27, 0.0  ;;  %v478_v30 = vpop.f32.mrb[2].mxu0  ;;  %v490_v31 = vpop.f32.mrb[2].mxu1 }
 0x10a   :  { %v197_v32 = vpop.f32.mrb[3].mxu0  ;;  %v237_v33 = vpop.f32.mrb[3].mxu1 }
 0x10b   :  { %v289_v34 = vmul.f32 %v444_v28, %v266_v29 }
 0x10d   :  { %305 = vadd.xlane.f32.xlu0 %v289_v34  ;;  %v481_v35 = vpop.f32.mrb[4].mxu0  ;;  %v493_v36 = vpop.f32.mrb[4].mxu1 }
 0x10e   :  { %v207_v37 = vpop.f32.mrb[5].mxu0  ;;  %v247_v38 = vpop.f32.mrb[5].mxu1 }
 0x111   :  { %v484_v39 = vpop.f32.mrb[6].mxu0  ;;  %v496_v40 = vpop.f32.mrb[6].mxu1 }
 0x112   :  { %v217_v41 = vpop.f32.mrb[7].mxu0  ;;  %v257_v42 = vpop.f32.mrb[7].mxu1 }
 0x19a   :  { %v306_v44 = vpop.xlane.xlu0 %305 }
 0x19b   :  { %405 = vst.msk [vmem:[%s706_s4] sm:$0xff] %vm404_vm1, %v306_v44 }
 0x19c   :  { %425 = vsyncpa [#allocation3], 1 }
 0x19d   :  { %426 = vsyncpa [#allocation5], 1 }

</bundles_post_ra>
